<compile_context>
chip_gen: v6e
topology: v6e:2x2x1
jax: 0.10.0
libtpu: 0.0.40
codegen_flags: <defaults>
</compile_context>

<pallas_src>
import jax
import jax.numpy as jnp
from jax.experimental import pallas as pl
from jax.experimental.pallas import tpu as pltpu


def _round_up(a, b):
    return (a + b - 1) // b * b


def _select_nk_tiles(n, k, *, tn_cap=1024, tk_cap=2048):
    """Tile sizes / padded extents for the output (N) and reduction (K) axes.

    Depends only on (N, K) so the masked weight can be prepared / padded once
    and reused for any batch size.
    """
    tk = min(_round_up(k, 128), tk_cap)
    kp = _round_up(k, tk)

    na = _round_up(n, 128)
    nj = pl.cdiv(na, tn_cap)
    # Guarantee >=2 steps on the "parallel" j axis when it costs no extra
    # padding, so both v7x TensorCores get work even at a single batch tile.
    if nj == 1 and na >= 256 and na % 256 == 0:
        nj = 2
    tn = _round_up(pl.cdiv(na, nj), 128)
    np_ = nj * tn
    return tn, tk, np_, kp


def _matmul_kernel_single(x_ref, w_ref, o_ref):
    """K fits in one tile: no accumulator round-trip, write the tile directly."""
    o_ref[...] = jnp.dot(
        x_ref[...], w_ref[...], preferred_element_type=jnp.float32
    ).astype(o_ref.dtype)


def _matmul_kernel_acc(x_ref, w_ref, o_ref, acc_ref):
    """Multi-step K reduction with an f32 VMEM accumulator."""
    kk = pl.program_id(2)

    @pl.when(kk == 0)
    def _():
        acc_ref[...] = jnp.zeros_like(acc_ref)

    acc_ref[...] += jnp.dot(
        x_ref[...], w_ref[...], preferred_element_type=jnp.float32
    )

    @pl.when(kk == pl.num_programs(2) - 1)
    def _():
        o_ref[...] = acc_ref[...].astype(o_ref.dtype)


def prepare_masked_weight(weight, mask, *, compute_dtype=jnp.bfloat16,
                          tn_cap=1024, tk_cap=2048):
    """One-time prep: fold the connectivity mask into the weight, transpose to
    (K, N) (MXU-native RHS layout), cast to the compute dtype and zero-pad to
    tile multiples.  Cache the result across forward calls for static masks.
    """
    n, k = weight.shape
    assert mask.shape == (n, k)
    tn, tk, np_, kp = _select_nk_tiles(n, k, tn_cap=tn_cap, tk_cap=tk_cap)

    # Exact fold in f32, then a single cast (no precision loss for the mask).
    ew_t = (weight.astype(jnp.float32) * mask.astype(jnp.float32)).T
    ew_t = ew_t.astype(compute_dtype)
    if (kp, np_) != (k, n):
        ew_t = jnp.pad(ew_t, ((0, kp - k), (0, np_ - n)))
    return ew_t


def sublayer_apply(x, masked_weight_t, out_features, *,
                   compute_dtype=jnp.bfloat16, tm=None,
                   tn_cap=1024, tk_cap=2048):
    """out = x @ (weight * mask).T given a prepared masked_weight_t (Kp, Np)."""
    m, k = x.shape
    n = out_features
    out_dtype = x.dtype

    tn, tk, np_, kp = _select_nk_tiles(n, k, tn_cap=tn_cap, tk_cap=tk_cap)
    assert masked_weight_t.shape == (kp, np_), (
        "masked_weight_t was prepared with different shapes / tile caps")
    assert masked_weight_t.dtype == jnp.dtype(compute_dtype)

    if tm is None:
        # Multiple-of-16 batch tiles keep bf16 vregs fully packed (sublane dim).
        align = 16 if (jnp.dtype(compute_dtype).itemsize == 2 and m >= 16) else 8
        tm = min(_round_up(m, align), 512)
    mp = _round_up(m, tm)

    # Cast + zero-pad x in one fused XLA pass (zeros don't change the matmul).
    xc = x.astype(compute_dtype)
    if (mp, kp) != (m, k):
        xc = jnp.pad(xc, ((0, mp - m), (0, kp - k)))

    ni, nj, nk = mp // tm, np_ // tn, kp // tk
    grid = (ni, nj, nk)

    if nk == 1:
        kernel = _matmul_kernel_single
        scratch = []
    else:
        kernel = _matmul_kernel_acc
        scratch = [pltpu.VMEM((tm, tn), jnp.float32)]

    bpe = jnp.dtype(compute_dtype).itemsize
    obpe = jnp.dtype(out_dtype).itemsize
    # Double-buffered tiles + f32 accumulator + 50% headroom for Mosaic
    # internal scratch; capped well under v7x's 64 MiB/TensorCore VMEM.
    tile_bytes = 2 * (tm * tk * bpe + tk * tn * bpe + tm * tn * obpe)
    if nk > 1:
        tile_bytes += tm * tn * 4
    vmem_limit = int(min(max(tile_bytes + tile_bytes // 2, 32 << 20), 48 << 20))

    cost = pl.CostEstimate(
        flops=2 * m * n * k,
        transcendentals=0,
        bytes_accessed=m * k * bpe + k * n * bpe + m * n * obpe,
    )

    out = pl.pallas_call(
        kernel,
        out_shape=jax.ShapeDtypeStruct((mp, np_), out_dtype),
        grid_spec=pltpu.PrefetchScalarGridSpec(
            num_scalar_prefetch=0,
            grid=grid,
            in_specs=[
                pl.BlockSpec((tm, tk), lambda i, j, kk: (i, kk)),   # x
                pl.BlockSpec((tk, tn), lambda i, j, kk: (kk, j)),   # (w*mask).T
            ],
            out_specs=pl.BlockSpec((tm, tn), lambda i, j, kk: (i, j)),
            scratch_shapes=scratch,
        ),
        compiler_params=pltpu.CompilerParams(
            dimension_semantics=("parallel", "parallel", "arbitrary"),
            vmem_limit_bytes=vmem_limit,
        ),
        cost_estimate=cost,
    )(xc, masked_weight_t)

    if (mp, np_) != (m, n):
        out = out[:m, :n]
    return out


def sublayer_forward(x, weight, mask, *, compute_dtype=jnp.bfloat16,
                     tm=None, tn_cap=1024, tk_cap=2048):
    """Convenience wrapper: out = x @ (weight * mask).T.

    Re-prepares the masked weight every call; for repeated forwards with a
    static connectivity mask, call prepare_masked_weight() once and reuse the
    result with sublayer_apply().
    """
    ew_t = prepare_masked_weight(weight, mask, compute_dtype=compute_dtype,
                                 tn_cap=tn_cap, tk_cap=tk_cap)
    return sublayer_apply(x, ew_t, weight.shape[0], compute_dtype=compute_dtype,
                          tm=tm, tn_cap=tn_cap, tk_cap=tk_cap)


if __name__ == "__main__":
    # Small deterministic example consistent with subLayer(input_features,
    # output_features): x:(batch, in), weight/mask:(out, in).
    batch = 8
    input_features = 256
    output_features = 128

    key = jax.random.PRNGKey(0)
    kx, kw, km = jax.random.split(key, 3)

    x = jax.random.normal(kx, (batch, input_features), dtype=jnp.float32)
    weight = jax.random.normal(
        kw, (output_features, input_features), dtype=jnp.float32) * 0.02
    mask = (jax.random.uniform(km, (output_features, input_features)) < 0.5
            ).astype(jnp.int8)

    # One-time prep (fold mask, transpose to (K, N), cast, pad) -- cacheable.
    ew_t = prepare_masked_weight(weight, mask)
    out = jax.block_until_ready(sublayer_apply(x, ew_t, output_features))
    assert out.shape == (batch, output_features)
    assert out.dtype == x.dtype

    maskf = mask.astype(jnp.float32)
    ew = weight * maskf

    # Reference with the same bf16 quantization of x and the folded weight,
    # f32 accumulation (matches the kernel's default compute path).
    ref_bf16 = (x.astype(jnp.bfloat16).astype(jnp.float32)
                @ ew.astype(jnp.bfloat16).astype(jnp.float32).T)
    assert jnp.allclose(out, ref_bf16, atol=1e-3, rtol=1e-3)

    # Loose sanity check vs the full-precision reference.
    ref_f32 = jnp.dot(x, ew.T, precision=jax.lax.Precision.HIGHEST)
    assert jnp.allclose(out, ref_f32, atol=5e-2, rtol=5e-2)

    # f32 compute path (full PyTorch-parity precision).
    out_f32 = jax.block_until_ready(
        sublayer_forward(x, weight, mask, compute_dtype=jnp.float32))
    assert jnp.allclose(out_f32, ref_f32, atol=2e-3, rtol=2e-3)

    # Tiny tile caps to exercise the multi-step K reduction (accumulator path).
    out_acc = jax.block_until_ready(
        sublayer_forward(x, weight, mask, tn_cap=128, tk_cap=128))
    assert jnp.allclose(out_acc, ref_bf16, atol=1e-3, rtol=1e-3)

    print("KERNEL_OK")
</pallas_src>

<mosaic_0001>
module attributes {stable_mosaic.version = 11 : i64} {
  func.func @_matmul_kernel_single(%arg0: i32, %arg1: i32, %arg2: i32, %arg3: memref<8x256xbf16, #tpu.memory_space<vmem>>, %arg4: memref<256x128xbf16, #tpu.memory_space<vmem>>, %arg5: memref<8x128xf32, #tpu.memory_space<vmem>>) attributes {dimension_semantics = [#tpu.dimension_semantics<parallel>, #tpu.dimension_semantics<parallel>, #tpu.dimension_semantics<arbitrary>], iteration_bounds = array<i64: 1, 1, 1>, scalar_prefetch = 0 : i64, scratch_operands = 0 : i64, tpu.core_type = #tpu.core_type<tc>, window_params = [{transform_indices = @transform_0, window_bounds = array<i64: 8, 256>}, {transform_indices = @transform_1, window_bounds = array<i64: 256, 128>}, {transform_indices = @transform_2, window_bounds = array<i64: 8, 128>}]} {
    %c0 = arith.constant 0 : index
    %c0_0 = arith.constant 0 : index
    %0 = vector.load %arg3[%c0, %c0_0] : memref<8x256xbf16, #tpu.memory_space<vmem>>, vector<8x256xbf16>
    %c0_1 = arith.constant 0 : index
    %c0_2 = arith.constant 0 : index
    %1 = vector.load %arg4[%c0_1, %c0_2] : memref<256x128xbf16, #tpu.memory_space<vmem>>, vector<256x128xbf16>
    %cst = arith.constant dense<0.000000e+00> : vector<8x128xf32>
    %2 = tpu.matmul %0, %1, %cst {dimension_numbers = #tpu.dot_dimension_numbers<[1], [0], [0], [1], [0, 0, 1, 1], [], []>} : vector<8x256xbf16>, vector<256x128xbf16>, vector<8x128xf32> -> vector<8x128xf32>
    %c0_3 = arith.constant 0 : index
    %c0_4 = arith.constant 0 : index
    %3 = vector.load %arg5[%c0_3, %c0_4] : memref<8x128xf32, #tpu.memory_space<vmem>>, vector<8x128xf32>
    tpu.vector_store %arg5[%c0_3, %c0_4], %2 {strides = array<i32>} : memref<8x128xf32, #tpu.memory_space<vmem>>, vector<8x128xf32>,
    return
  }
  func.func @transform_0(%arg0: i32, %arg1: i32, %arg2: i32) -> (i32, i32) {
    %c0_i32 = arith.constant 0 : i32
    return %arg0, %arg2 : i32, i32
  }
  func.func @transform_1(%arg0: i32, %arg1: i32, %arg2: i32) -> (i32, i32) {
    %c0_i32 = arith.constant 0 : i32
    return %arg2, %arg1 : i32, i32
  }
  func.func @transform_2(%arg0: i32, %arg1: i32, %arg2: i32) -> (i32, i32) {
    %c0_i32 = arith.constant 0 : i32
    return %arg0, %arg1 : i32, i32
  }
}

</mosaic_0001>

<bundles_post_ra>
// kernel: tpu_custom_call.1
= control target key start
LH: loop header
LB: loop body
LE: loop exit
PB: predicated region body
PF: predicated region fallthrough
CT: control target
= control target key end

     0   :  { %7 = vsyncpa [#allocation3], 0  ;;  %s390_s0 = inlined_call_operand.hbm [shape: bf16[8,256], index: 0, kind: input, shape index: {}]   ;;  %s391_s1 = inlined_call_operand.hbm [shape: bf16[256,128], index: 1, kind: input, shape index: {}]   ;;  %s392_s2 = inlined_call_operand.hbm [shape: f32[8,128], index: 2, kind: output, shape index: {}]  }
   0x1   :  { %8 = vsyncpa [#allocation6], 0 }
   0x2   :  { %9 = vsyncpa [#allocation4], 0  ;;  %s361_s9 = smov [#allocation2]   ;;  %s362_s11 = smov [#allocation5]  }
   0x3   :  { %s16_s10 = sshll.u32 %s361_s9, 4  ;;  %s25_s12 = sshll.u32 %s362_s11, 4  ;;  %s17_s10 = int_to_ptr.vmem [resolvable:$true] %s16_s10  ;;  %s26_s12 = int_to_ptr.vmem [resolvable:$true] %s25_s12 }
   0x4   :  { %s303_s13 = scalar_lea.vmem %s17_s10, 128  ;;  %p308_p1 = scmp.lt.s32.totalorder %s17_s10, %s17_s10 }
   0x5   :  { %p304_p0 = scmp.ne.s32.totalorder %s17_s10, %s303_s13  ;;  %p309_p2 = scmp.lt.s32.totalorder %s303_s13, %s303_s13 }
   0x7   :  { %p310_p3 = por %p309_p2, %p308_p1 }
   0x9   :  { %p311_p4 = pnand %p310_p3, %p304_p0 }
   0xb   :  { %314 = shalt.err (!%p311_p4)
}
   0xc   :  { %19 = dma.hbm_to_vmem [thread:$0]  %s390_s0, 128, %s17_s10, [#allocation3]  }
   0xd   :  { %s323_s16 = scalar_lea.vmem %s26_s12, 2048  ;;  %p328_p6 = scmp.lt.s32.totalorder %s26_s12, %s26_s12 }
   0xe   :  { %p324_p5 = scmp.ne.s32.totalorder %s26_s12, %s323_s16  ;;  %p329_p7 = scmp.lt.s32.totalorder %s323_s16, %s323_s16 }
  0x10   :  { %p330_p8 = por %p329_p7, %p328_p6 }
  0x12   :  { %p331_p9 = pnand %p330_p8, %p324_p5 }
  0x14   :  { %334 = shalt.err (!%p331_p9)
}
  0x15   :  { %s363_s17 = smov 64   ;;  %s364_s18 = smov 4  }
  0x16   :  { %31 = dma.hbm_to_vmem [thread:$0]  %s391_s1, 2048, %s26_s12, [#allocation6], %s363_s17, %s363_s17, %s364_s18  }
  0x17   :  { %355 = dma.done.wait [#allocation3], 128  }
  0x18   :  { %356 = vsyncadd [#allocation3], 4294967168 }
  0x19   :  { %357 = dma.done.wait [#allocation6], 2048  }
  0x1a   :  { %358 = vsyncadd [#allocation6], 4294965248  ;;  %v277_v0 = vld [vmem:[#allocation5 + $0x78] sm:$0xff]   ;;  %v279_v2 = vld [vmem:[#allocation5 + $0x70] sm:$0xff]   ;;  %s365_s0 = smov [#allocation7]  }
  0x1b   :  { %v278_v1 = vld [vmem:[#allocation5 + $0x38] sm:$0xff]   ;;  %250 = vmatprep.subr.bf16.mxu0 %v277_v0  ;;  %v280_v3 = vld [vmem:[#allocation5 + $0x30] sm:$0xff]   ;;  %v281_v4 = vld [vmem:[#allocation5 + $0x68] sm:$0xff]   ;;  %s222_s1 = sshll.u32 %s365_s0, 4  ;;  %s223_s1 = int_to_ptr.vmem [resolvable:$true] %s222_s1 }
  0x1c   :  { %251 = vmatpush3.bf16.msra.mxu0 %v278_v1  ;;  %v282_v5 = vld [vmem:[#allocation5 + $0x28] sm:$0xff]   ;;  %v283_v6 = vld [vmem:[#allocation5 + $0x60] sm:$0xff]   ;;  %v285_v8 = vld [vmem:[#allocation5 + $0x58] sm:$0xff]   ;;  %s335_s21 = scalar_lea.vmem %s223_s1, 128  ;;  %p340_p11 = scmp.lt.s32.totalorder %s223_s1, %s223_s1 }
  0x1d   :  { %252 = vmatprep.subr.bf16.mxu0 %v279_v2  ;;  %v284_v7 = vld [vmem:[#allocation5 + $0x20] sm:$0xff]   ;;  %v286_v9 = vld [vmem:[#allocation5 + $0x18] sm:$0xff]   ;;  %v287_v10 = vld [vmem:[#allocation5 + $0x50] sm:$0xff]   ;;  %p336_p10 = scmp.ne.s32.totalorder %s223_s1, %s335_s21  ;;  %p341_p12 = scmp.lt.s32.totalorder %s335_s21, %s335_s21 }
  0x1e   :  { %v39_v11 = vld [vmem:[#allocation2] sm:$0xff]  ;;  %v288_v13 = vld [vmem:[#allocation5 + $0x10] sm:$0xff]   ;;  %v289_v14 = vld [vmem:[#allocation5 + $0x48] sm:$0xff]  }
  0x1f   :  { %v233_v12 = vcombine.high %v39_v11, %v39_v11  ;;  %v290_v15 = vld [vmem:[#allocation5 + $0x8] sm:$0xff]   ;;  %v291_v16 = vld [vmem:[#allocation5 + $0x40] sm:$0xff]   ;;  %v232_v18 = vcombine.low %v39_v11, %v39_v11  ;;  %p342_p13 = por %p341_p12, %p340_p11 }
  0x20   :  { %253 = vmatpush3.bf16.msra.mxu0 %v280_v3  ;;  %v292_v17 = vld [vmem:[#allocation5] sm:$0xff]  }
  0x21   :  { %254 = vmatprep.subr.bf16.mxu0 %v281_v4  ;;  %207 = vmatprep.mubr.bf16.mxu0 %v233_v12  ;;  %p343_p0 = pnand %p342_p13, %p336_p10 }
  0x24   :  { %255 = vmatpush3.bf16.msra.mxu0 %v282_v5 }
  0x25   :  { %256 = vmatprep.subr.bf16.mxu0 %v283_v6 }
  0x28   :  { %257 = vmatpush3.bf16.msra.mxu0 %v284_v7 }
  0x29   :  { %258 = vmatprep.subr.bf16.mxu0 %v285_v8 }
  0x2c   :  { %259 = vmatpush3.bf16.msra.mxu0 %v286_v9 }
  0x2d   :  { %260 = vmatprep.subr.bf16.mxu0 %v287_v10 }
  0x30   :  { %261 = vmatpush3.bf16.msra.mxu0 %v288_v13 }
  0x31   :  { %262 = vmatprep.subr.bf16.mxu0 %v289_v14 }
  0x34   :  { %263 = vmatpush3.bf16.msra.mxu0 %v290_v15 }
  0x35   :  { %264 = vmatprep.subr.bf16.mxu0 %v291_v16 }
  0x38   :  { %265 = vmatpush3.bf16.msra.mxu0 %v292_v17 }
  0x3b   :  { %208 = vmatmul.mubr.bf16.vlgmr.msra.gmra.mxu0 %v232_v18 }
  0xfb   :  { %v266_v19 = vpop.f32.mrf.mxu0 }
  0xfd   :  { %v267_v20 = vpop.f32.mrf.mxu0 }
  0xfe   :  { %v268_v21 = vadd.f32 %v267_v20, %v266_v19 }
  0xff   :  { %v269_v22 = vpop.f32.mrf.mxu0 }
 0x100   :  { %215 = vst [vmem:[#allocation7] sm:$0xff] %v268_v21 }
 0x101   :  { %v270_v23 = vpop.f32.mrf.mxu0 }
 0x102   :  { %346 = shalt.err (!%p343_p0)
}
 0x103   :  { %225 = dma.vmem_to_hbm [thread:$0]  %s223_s1, 128, %s392_s2, [#allocation4]  }
 0x104   :  { %359 = dma.done.wait [#allocation4], 128  }
 0x105   :  { %360 = vsyncadd [#allocation4], 4294967168 }
 0x106   :  { %229 = vsyncpa [#allocation3], 1 }
 0x107   :  { %230 = vsyncpa [#allocation6], 1 }
 0x108   :  { %231 = vsyncpa [#allocation4], 1 }

</bundles_post_ra>
